<compile_context>
chip_gen: v5e
topology: v5e:2x2
jax: 0.10.0
libtpu: 0.0.40
codegen_flags: <defaults>
</compile_context>

<pallas_src>
import jax
import jax.numpy as jnp
import numpy as np
from jax import lax
from jax.experimental import pallas as pl
from jax.experimental.pallas import tpu as pltpu


def _graph_filter_kernel(x_ref, s_ref, h_ref, b_ref, y_ref, z_ref):
    # x_ref : (Tt, F_in, N)          time-block of node signals (stream dtype)
    # s_ref : (Tt, E, N, N)          time-block of GSOs         (stream dtype)
    # h_ref : (F_out, E*K*F_in)      pre-flattened filter taps  (stream dtype)
    # b_ref : (F_out, 1)             bias (f32)
    # y_ref : (Tt, F_out, N)         output time-block
    # z_ref : (E*K*F_in, N) f32      carried stacked diffusion state, (e,k,fi) rows
    tb = pl.program_id(1)
    Tt, F_in, _ = x_ref.shape
    E = s_ref.shape[1]
    KF = z_ref.shape[0] // E        # K * F_in rows per edge block
    DF = KF - F_in                  # (K - 1) * F_in rows produced by diffusion
    stream_dtype = s_ref.dtype

    # First T-block of every batch element: previous z is all zeros, which
    # reproduces the zero-row prepended by the torch time shift.
    # INVARIANT: the T-block axis must remain the innermost grid axis and
    # sequential ("arbitrary") for this carried scratch to be correct.
    @pl.when(tb == 0)
    def _():
        z_ref[...] = jnp.zeros_like(z_ref)

    def step(t, carry):
        x_t = x_ref[t]                              # (F_in, N)

        # Graph diffusion: one stacked GEMM per edge feature.  Rows
        # 0..(K-1)*F_in-1 of edge e's block hold taps 0..K-2 at time t-1;
        # multiplying the whole stack by S_t[e] yields taps 1..K-1 at time t
        # in a single MXU pass.  E, K are small & static -> unrolled.
        for e in range(E):
            base = e * KF
            if DF > 0:
                # z is f32; cast only the MXU operand to the streaming dtype.
                lhs = z_ref[pl.ds(base, DF), :].astype(stream_dtype)
                d_e = jnp.dot(lhs, s_ref[t, e],
                              preferred_element_type=jnp.float32)
                # lhs/d_e are values (read above), so the in-place stores
                # below cannot clobber the dot's inputs.
                z_ref[pl.ds(base + F_in, DF), :] = d_e
            z_ref[pl.ds(base, F_in), :] = x_t.astype(jnp.float32)  # tap 0 = x(t)

        # Output projection: a single GEMM over the fused (e, k, f_in)
        # contraction dimension, f32 accumulation, plus bias.
        # TODO(synk): for F_out * N >> 32 vregs, split this dot + store over
        # N-column chunks (pairs naturally with the N-column grid axis TODO).
        acc = jnp.dot(h_ref[...], z_ref[...].astype(stream_dtype),
                      preferred_element_type=jnp.float32)
        y_ref[t] = (acc + b_ref[...].astype(jnp.float32)).astype(y_ref.dtype)
        return carry

    # Short slabs are unrolled for LLO scheduling visibility; long slabs use a
    # rolled loop to bound code size.
    lax.fori_loop(0, Tt, step, 0, unroll=(Tt <= 8))


def _vmem_capacity_bytes():
    """Physical VMEM of this generation (v5e/v6e: 128 MiB, v7x: 64 MiB/TC)."""
    try:
        cap = int(getattr(pltpu.get_tpu_info(), "vmem_capacity_bytes", 0))
        if cap > 0:
            return cap
    except Exception:
        pass
    return 64 * 1024 * 1024   # conservative default (v7x per-TensorCore)


def graph_filter_forward(x, S, H, bias=None, *, compute_dtype=None,
                         time_block=None, vmem_limit_bytes=None):
    """GraphFilter forward.  Pass bf16 x/S/H (or compute_dtype=jnp.bfloat16) to
    halve HBM traffic on the bandwidth-dominant S stream; accumulation and the
    carried recursion state stay f32."""
    B, T, F_in, N_in = x.shape
    assert S.shape[0] == B and S.shape[1] == T
    assert S.shape[3] == N_in and S.shape[4] == N_in
    E = S.shape[2]
    F_out, E_h, K, F_in_h = H.shape
    assert E_h == E and F_in_h == F_in
    out_dtype = x.dtype

    cdt = jnp.dtype(x.dtype if compute_dtype is None else compute_dtype)

    # Lane-dense blocks: pad N up to a multiple of 128 so x/S/y blocks use
    # unmasked vst's instead of masked partial stores.  (Align to 256 if the
    # kernel ever becomes MXU-bound on v6e/v7x.)
    N = ((N_in + 127) // 128) * 128
    if N != N_in:
        pn = N - N_in
        x = jnp.pad(x, ((0, 0), (0, 0), (0, 0), (0, pn)))
        S = jnp.pad(S, ((0, 0), (0, 0), (0, 0), (0, pn), (0, pn)))

    x_c = x.astype(cdt)
    S_c = S.astype(cdt)
    # TODO(synk): for even less HBM traffic, stream S as fp8 (v7x) / int8
    # (v5e/v6e) with a per-(b,t,e) scale and dequantize to bf16 in-kernel.
    # Pre-flatten + pre-cast the taps so the projection is one lane-dense GEMM;
    # (e, k, f_in) flattening order matches torch's H.reshape(F_out, E*K*F_in).
    H_flat = H.reshape(F_out, E * K * F_in).astype(cdt)
    bias_f32 = (jnp.zeros((F_out, 1), jnp.float32) if bias is None
                else bias.astype(jnp.float32))

    cs = cdt.itemsize
    out_cs = jnp.dtype(out_dtype).itemsize
    EKF = E * K * F_in

    # --- time-block size: fill (most of) this generation's VMEM --------------
    # Per time step (double-buffered): S slab (dominant) + x slab + y slab.
    per_t = 2 * (E * N * N + F_in * N) * cs + 2 * F_out * N * out_cs
    # Resident: H (double-buffered), bias, f32 z scratch, compiler slack.
    fixed = 2 * F_out * EKF * cs + 2 * F_out * 4 + EKF * N * 4 + (2 << 20)
    budget = int(0.82 * _vmem_capacity_bytes())   # ~52 MiB v7x, ~105 MiB v5e/v6e
    if time_block is None:
        time_block = min(T, max(1, (budget - fixed) // max(per_t, 1)))
    # No partial T-blocks: pick the largest divisor of T that fits the budget.
    Tt = 1
    for cand in range(max(1, min(int(time_block), T)), 0, -1):
        if T % cand == 0:
            Tt = cand
            break
    # TODO(synk): if even Tt == 1 does not fit (2*E*N*N*cs ~ budget, i.e. very
    # large N on v7x), add an innermost N-column grid axis tiling the second N
    # of S and the columns of x/y/new-z; the tap-0 x_t overwrite must then be
    # deferred to the last column chunk so later chunks of the same t still
    # read tap-0 of t-1 at full width.

    if vmem_limit_bytes is None:
        need = Tt * per_t + fixed
        vmem_limit_bytes = int(min(max(need, 32 * 1024 * 1024), budget))

    grid_spec = pltpu.PrefetchScalarGridSpec(
        num_scalar_prefetch=0,
        # T-blocks innermost & sequential: tap-k(t) needs tap-(k-1)(t-1).
        grid=(B, T // Tt),
        in_specs=[
            pl.BlockSpec((None, Tt, F_in, N), lambda b, tb: (b, tb, 0, 0)),
            # NOTE: pipeline_mode=pl.Buffered(3) buys low single-digit % at
            # best once the T-blocked DMA is large & contiguous -- enable only
            # when 3*Tt*E*N*N*cs still fits the per-generation budget.
            pl.BlockSpec((None, Tt, E, N, N), lambda b, tb: (b, tb, 0, 0, 0)),
            pl.BlockSpec((F_out, EKF), lambda b, tb: (0, 0)),
            pl.BlockSpec((F_out, 1), lambda b, tb: (0, 0)),
        ],
        out_specs=pl.BlockSpec((None, Tt, F_out, N), lambda b, tb: (b, tb, 0, 0)),
        # Carried recursion state stays f32 (never re-quantized; 8-row-aligned
        # pl.ds stores) regardless of the streaming dtype.
        scratch_shapes=[pltpu.VMEM((EKF, N), jnp.float32)],
    )

    # Advisory cost so XLA can schedule surrounding ops around this HBM-heavy
    # custom call.
    flops = 2 * B * T * (E * (K - 1) * F_in * N * N + F_out * EKF * N)
    bytes_accessed = (S_c.size * cs + x_c.size * cs
                      + B * T * F_out * N * out_cs
                      + H_flat.size * cs + bias_f32.size * 4)
    cost = pl.CostEstimate(flops=flops, transcendentals=0,
                           bytes_accessed=bytes_accessed)

    y = pl.pallas_call(
        _graph_filter_kernel,
        out_shape=jax.ShapeDtypeStruct((B, T, F_out, N), out_dtype),
        grid_spec=grid_spec,
        compiler_params=pltpu.CompilerParams(
            # B is independent (scratch re-zeroed at the first T-block), so it
            # shards across v7x's 2 TensorCores (measured-neutral on v5e/v6e).
            # If the production shape has B == 1 on v7x, split another
            # independent axis (e.g. E, with a cross-core reduction) instead.
            dimension_semantics=("parallel", "arbitrary"),
            vmem_limit_bytes=int(vmem_limit_bytes),
        ),
        cost_estimate=cost,
    )(x_c, S_c, H_flat, bias_f32)

    if N != N_in:
        y = y[..., :N_in]
    return y


def reference_forward(x, S, H, bias):
    """Plain-JAX transcription of the torch forward (for verification)."""
    B, T, F_in, N = x.shape
    E = S.shape[2]
    F_out, _, K, _ = H.shape
    xr = jnp.broadcast_to(x[:, :, None], (B, T, E, F_in, N))
    z = xr[:, :, None]                                     # (B,T,1,E,F_in,N)
    xc = xr
    for _ in range(1, K):
        xc = xc[:, :T - 1]
        zero = jnp.zeros((B, 1, E, F_in, N), x.dtype)
        xc = jnp.concatenate([zero, xc], axis=1)
        xc = jnp.matmul(xc, S)                             # (B,T,E,F_in,N)
        z = jnp.concatenate([z, xc[:, :, None]], axis=2)
    z = jnp.transpose(z, (0, 1, 5, 3, 2, 4))               # (B,T,N,E,K,F_in)
    z = z.reshape(B, T, N, E * K * F_in)
    Hm = H.reshape(F_out, E * K * F_in).T
    y = jnp.matmul(z, Hm)                                  # (B,T,N,F_out)
    y = jnp.transpose(y, (0, 1, 3, 2))                     # (B,T,F_out,N)
    return y + bias


if __name__ == "__main__":
    # Tile-friendly small shapes: N multiple of 128, F_in/F_out multiples of 8.
    B, T, E, K, F_in, F_out, N = 2, 4, 2, 3, 8, 16, 128

    key = jax.random.PRNGKey(0)
    kx, ks, kh, kb = jax.random.split(key, 4)
    x = jax.random.normal(kx, (B, T, F_in, N), jnp.float32)
    S = jax.random.normal(ks, (B, T, E, N, N), jnp.float32) / jnp.sqrt(N)
    H = jax.random.normal(kh, (F_out, E, K, F_in), jnp.float32) * 0.1
    bias = jax.random.normal(kb, (F_out, 1), jnp.float32)

    y_ref = reference_forward(x, S, H, bias)

    # f32 run, auto time-block (whole T in one slab here).
    y = jax.block_until_ready(graph_filter_forward(x, S, H, bias))
    assert y.shape == (B, T, F_out, N)
    np.testing.assert_allclose(np.asarray(y), np.asarray(y_ref),
                               rtol=2e-4, atol=2e-4)

    # Forced smaller time-block: exercises the carried z scratch across
    # multiple T-block grid iterations of the same batch element.
    y_tb = jax.block_until_ready(graph_filter_forward(x, S, H, bias,
                                                      time_block=2))
    np.testing.assert_allclose(np.asarray(y_tb), np.asarray(y_ref),
                               rtol=2e-4, atol=2e-4)

    # bf16-streamed run (halves HBM bytes of the bandwidth-bound S stream);
    # the carried state and accumulation stay f32 in-kernel.
    x_b, S_b, H_b = (a.astype(jnp.bfloat16) for a in (x, S, H))
    y_b = jax.block_until_ready(graph_filter_forward(x_b, S_b, H_b, bias))
    y_bref = reference_forward(x_b.astype(jnp.float32), S_b.astype(jnp.float32),
                               H_b.astype(jnp.float32), bias)
    np.testing.assert_allclose(np.asarray(y_b.astype(jnp.float32)),
                               np.asarray(y_bref), rtol=6e-2, atol=6e-2)

    # Non-multiple-of-128 N: exercises the lane-dense padding path.
    B2, T2, E2, K2, Fi2, Fo2, N2 = 1, 3, 1, 2, 8, 8, 96
    k2 = jax.random.split(key, 8)
    x2 = jax.random.normal(k2[4], (B2, T2, Fi2, N2), jnp.float32)
    S2 = jax.random.normal(k2[5], (B2, T2, E2, N2, N2), jnp.float32) / jnp.sqrt(N2)
    H2 = jax.random.normal(k2[6], (Fo2, E2, K2, Fi2), jnp.float32) * 0.1
    b2 = jax.random.normal(k2[7], (Fo2, 1), jnp.float32)
    y2 = jax.block_until_ready(graph_filter_forward(x2, S2, H2, b2))
    np.testing.assert_allclose(np.asarray(y2),
                               np.asarray(reference_forward(x2, S2, H2, b2)),
                               rtol=2e-4, atol=2e-4)

    print("KERNEL_OK")
</pallas_src>

<mosaic_0001>
module attributes {stable_mosaic.version = 11 : i64} {
  func.func @_graph_filter_kernel(%arg0: i32, %arg1: i32, %arg2: memref<1x4x8x128xf32, #tpu.memory_space<vmem>>, %arg3: memref<1x4x2x128x128xf32, #tpu.memory_space<vmem>>, %arg4: memref<16x48xf32, #tpu.memory_space<vmem>>, %arg5: memref<16x1xf32, #tpu.memory_space<vmem>>, %arg6: memref<1x4x16x128xf32, #tpu.memory_space<vmem>>, %arg7: memref<48x128xf32, #tpu.memory_space<vmem>>) attributes {dimension_semantics = [#tpu.dimension_semantics<parallel>, #tpu.dimension_semantics<arbitrary>], iteration_bounds = array<i64: 2, 1>, scalar_prefetch = 0 : i64, scratch_operands = 1 : i64, tpu.core_type = #tpu.core_type<tc>, window_params = [{transform_indices = @transform_0, window_bounds = array<i64: 1, 4, 8, 128>}, {transform_indices = @transform_1, window_bounds = array<i64: 1, 4, 2, 128, 128>}, {pipeline_mode = #tpu.pipeline_mode<synchronous>, transform_indices = @transform_2, window_bounds = array<i64: 16, 48>}, {pipeline_mode = #tpu.pipeline_mode<synchronous>, transform_indices = @transform_3, window_bounds = array<i64: 16, 1>}, {transform_indices = @transform_4, window_bounds = array<i64: 1, 4, 16, 128>}]} {
    %c0_i32 = arith.constant 0 : i32
    %0 = arith.cmpi eq, %arg1, %c0_i32 : i32
    %1 = arith.extui %0 : i1 to i32
    %c0_i32_0 = arith.constant 0 : i32
    %2 = arith.cmpi ne, %1, %c0_i32_0 : i32
    scf.if %2 {
      %cst_136 = arith.constant 0.000000e+00 : f32
      %111 = vector.broadcast %cst_136 : f32 to vector<48x128xf32>
      %c0_137 = arith.constant 0 : index
      %c0_138 = arith.constant 0 : index
      %112 = vector.load %arg7[%c0_137, %c0_138] : memref<48x128xf32, #tpu.memory_space<vmem>>, vector<48x128xf32>
      tpu.vector_store %arg7[%c0_137, %c0_138], %111 {strides = array<i32>} : memref<48x128xf32, #tpu.memory_space<vmem>>, vector<48x128xf32>,
    } else {
    }
    %c0_i32_1 = arith.constant 0 : i32
    %c0 = arith.constant 0 : index
    %3 = arith.index_cast %c0_i32_1 : i32 to index
    %c0_2 = arith.constant 0 : index
    %c0_3 = arith.constant 0 : index
    %4 = vector.load %arg2[%c0, %3, %c0_2, %c0_3] : memref<1x4x8x128xf32, #tpu.memory_space<vmem>>, vector<1x1x8x128xf32>
    %5 = vector.shape_cast %4 : vector<1x1x8x128xf32> to vector<8x128xf32>
    %c0_4 = arith.constant 0 : index
    %c0_5 = arith.constant 0 : index
    %6 = vector.load %arg7[%c0_4, %c0_5] : memref<48x128xf32, #tpu.memory_space<vmem>>, vector<16x128xf32>
    %c0_6 = arith.constant 0 : index
    %7 = arith.index_cast %c0_i32_1 : i32 to index
    %c0_7 = arith.constant 0 : index
    %c0_8 = arith.constant 0 : index
    %c0_9 = arith.constant 0 : index
    %8 = vector.load %arg3[%c0_6, %7, %c0_7, %c0_8, %c0_9] : memref<1x4x2x128x128xf32, #tpu.memory_space<vmem>>, vector<1x1x1x128x128xf32>
    %9 = vector.shape_cast %8 : vector<1x1x1x128x128xf32> to vector<128x128xf32>
    %cst = arith.constant dense<0.000000e+00> : vector<16x128xf32>
    %10 = tpu.matmul %6, %9, %cst {dimension_numbers = #tpu.dot_dimension_numbers<[1], [0], [0], [1], [0, 0, 1, 1], [], []>} : vector<16x128xf32>, vector<128x128xf32>, vector<16x128xf32> -> vector<16x128xf32>
    %c8 = arith.constant 8 : index
    %c0_10 = arith.constant 0 : index
    %11 = vector.load %arg7[%c8, %c0_10] : memref<48x128xf32, #tpu.memory_space<vmem>>, vector<16x128xf32>
    tpu.vector_store %arg7[%c8, %c0_10], %10 {strides = array<i32>} : memref<48x128xf32, #tpu.memory_space<vmem>>, vector<16x128xf32>,
    %c0_11 = arith.constant 0 : index
    %c0_12 = arith.constant 0 : index
    %12 = vector.load %arg7[%c0_11, %c0_12] : memref<48x128xf32, #tpu.memory_space<vmem>>, vector<8x128xf32>
    tpu.vector_store %arg7[%c0_11, %c0_12], %5 {strides = array<i32>} : memref<48x128xf32, #tpu.memory_space<vmem>>, vector<8x128xf32>,
    %c24 = arith.constant 24 : index
    %c0_13 = arith.constant 0 : index
    %13 = vector.load %arg7[%c24, %c0_13] : memref<48x128xf32, #tpu.memory_space<vmem>>, vector<16x128xf32>
    %c0_14 = arith.constant 0 : index
    %14 = arith.index_cast %c0_i32_1 : i32 to index
    %c1 = arith.constant 1 : index
    %c0_15 = arith.constant 0 : index
    %c0_16 = arith.constant 0 : index
    %15 = vector.load %arg3[%c0_14, %14, %c1, %c0_15, %c0_16] : memref<1x4x2x128x128xf32, #tpu.memory_space<vmem>>, vector<1x1x1x128x128xf32>
    %16 = vector.shape_cast %15 : vector<1x1x1x128x128xf32> to vector<128x128xf32>
    %cst_17 = arith.constant dense<0.000000e+00> : vector<16x128xf32>
    %17 = tpu.matmul %13, %16, %cst_17 {dimension_numbers = #tpu.dot_dimension_numbers<[1], [0], [0], [1], [0, 0, 1, 1], [], []>} : vector<16x128xf32>, vector<128x128xf32>, vector<16x128xf32> -> vector<16x128xf32>
    %c32 = arith.constant 32 : index
    %c0_18 = arith.constant 0 : index
    %18 = vector.load %arg7[%c32, %c0_18] : memref<48x128xf32, #tpu.memory_space<vmem>>, vector<16x128xf32>
    tpu.vector_store %arg7[%c32, %c0_18], %17 {strides = array<i32>} : memref<48x128xf32, #tpu.memory_space<vmem>>, vector<16x128xf32>,
    %c24_19 = arith.constant 24 : index
    %c0_20 = arith.constant 0 : index
    %19 = vector.load %arg7[%c24_19, %c0_20] : memref<48x128xf32, #tpu.memory_space<vmem>>, vector<8x128xf32>
    tpu.vector_store %arg7[%c24_19, %c0_20], %5 {strides = array<i32>} : memref<48x128xf32, #tpu.memory_space<vmem>>, vector<8x128xf32>,
    %c0_21 = arith.constant 0 : index
    %c0_22 = arith.constant 0 : index
    %20 = vector.load %arg4[%c0_21, %c0_22] : memref<16x48xf32, #tpu.memory_space<vmem>>, vector<16x48xf32>
    %c0_23 = arith.constant 0 : index
    %c0_24 = arith.constant 0 : index
    %21 = vector.load %arg7[%c0_23, %c0_24] : memref<48x128xf32, #tpu.memory_space<vmem>>, vector<48x128xf32>
    %cst_25 = arith.constant dense<0.000000e+00> : vector<16x128xf32>
    %22 = tpu.matmul %20, %21, %cst_25 {dimension_numbers = #tpu.dot_dimension_numbers<[1], [0], [0], [1], [0, 0, 1, 1], [], []>} : vector<16x48xf32>, vector<48x128xf32>, vector<16x128xf32> -> vector<16x128xf32>
    %c0_26 = arith.constant 0 : index
    %c0_27 = arith.constant 0 : index
    %23 = vector.load %arg5[%c0_26, %c0_27] : memref<16x1xf32, #tpu.memory_space<vmem>>, vector<16x1xf32>
    %24 = vector.broadcast %23 : vector<16x1xf32> to vector<16x128xf32>
    %25 = arith.addf %22, %24 : vector<16x128xf32>
    %c0_28 = arith.constant 0 : index
    %26 = arith.index_cast %c0_i32_1 : i32 to index
    %c0_29 = arith.constant 0 : index
    %c0_30 = arith.constant 0 : index
    %27 = vector.load %arg6[%c0_28, %26, %c0_29, %c0_30] : memref<1x4x16x128xf32, #tpu.memory_space<vmem>>, vector<1x1x16x128xf32>
    %28 = vector.shape_cast %27 : vector<1x1x16x128xf32> to vector<16x128xf32>
    %29 = vector.shape_cast %25 : vector<16x128xf32> to vector<1x1x16x128xf32>
    tpu.vector_store %arg6[%c0_28, %26, %c0_29, %c0_30], %29 {strides = array<i32>} : memref<1x4x16x128xf32, #tpu.memory_space<vmem>>, vector<1x1x16x128xf32>,
    %c1_i32 = arith.constant 1 : i32
    %c0_31 = arith.constant 0 : index
    %30 = arith.index_cast %c1_i32 : i32 to index
    %c0_32 = arith.constant 0 : index
    %c0_33 = arith.constant 0 : index
    %31 = vector.load %arg2[%c0_31, %30, %c0_32, %c0_33] : memref<1x4x8x128xf32, #tpu.memory_space<vmem>>, vector<1x1x8x128xf32>
    %32 = vector.shape_cast %31 : vector<1x1x8x128xf32> to vector<8x128xf32>
    %c0_34 = arith.constant 0 : index
    %c0_35 = arith.constant 0 : index
    %33 = vector.load %arg7[%c0_34, %c0_35] : memref<48x128xf32, #tpu.memory_space<vmem>>, vector<16x128xf32>
    %c0_36 = arith.constant 0 : index
    %34 = arith.index_cast %c1_i32 : i32 to index
    %c0_37 = arith.constant 0 : index
    %c0_38 = arith.constant 0 : index
    %c0_39 = arith.constant 0 : index
    %35 = vector.load %arg3[%c0_36, %34, %c0_37, %c0_38, %c0_39] : memref<1x4x2x128x128xf32, #tpu.memory_space<vmem>>, vector<1x1x1x128x128xf32>
    %36 = vector.shape_cast %35 : vector<1x1x1x128x128xf32> to vector<128x128xf32>
    %cst_40 = arith.constant dense<0.000000e+00> : vector<16x128xf32>
    %37 = tpu.matmul %33, %36, %cst_40 {dimension_numbers = #tpu.dot_dimension_numbers<[1], [0], [0], [1], [0, 0, 1, 1], [], []>} : vector<16x128xf32>, vector<128x128xf32>, vector<16x128xf32> -> vector<16x128xf32>
    %c8_41 = arith.constant 8 : index
    %c0_42 = arith.constant 0 : index
    %38 = vector.load %arg7[%c8_41, %c0_42] : memref<48x128xf32, #tpu.memory_space<vmem>>, vector<16x128xf32>
    tpu.vector_store %arg7[%c8_41, %c0_42], %37 {strides = array<i32>} : memref<48x128xf32, #tpu.memory_space<vmem>>, vector<16x128xf32>,
    %c0_43 = arith.constant 0 : index
    %c0_44 = arith.constant 0 : index
    %39 = vector.load %arg7[%c0_43, %c0_44] : memref<48x128xf32, #tpu.memory_space<vmem>>, vector<8x128xf32>
    tpu.vector_store %arg7[%c0_43, %c0_44], %32 {strides = array<i32>} : memref<48x128xf32, #tpu.memory_space<vmem>>, vector<8x128xf32>,
    %c24_45 = arith.constant 24 : index
    %c0_46 = arith.constant 0 : index
    %40 = vector.load %arg7[%c24_45, %c0_46] : memref<48x128xf32, #tpu.memory_space<vmem>>, vector<16x128xf32>
    %c0_47 = arith.constant 0 : index
    %41 = arith.index_cast %c1_i32 : i32 to index
    %c1_48 = arith.constant 1 : index
    %c0_49 = arith.constant 0 : index
    %c0_50 = arith.constant 0 : index
    %42 = vector.load %arg3[%c0_47, %41, %c1_48, %c0_49, %c0_50] : memref<1x4x2x128x128xf32, #tpu.memory_space<vmem>>, vector<1x1x1x128x128xf32>
    %43 = vector.shape_cast %42 : vector<1x1x1x128x128xf32> to vector<128x128xf32>
    %cst_51 = arith.constant dense<0.000000e+00> : vector<16x128xf32>
    %44 = tpu.matmul %40, %43, %cst_51 {dimension_numbers = #tpu.dot_dimension_numbers<[1], [0], [0], [1], [0, 0, 1, 1], [], []>} : vector<16x128xf32>, vector<128x128xf32>, vector<16x128xf32> -> vector<16x128xf32>
    %c32_52 = arith.constant 32 : index
    %c0_53 = arith.constant 0 : index
    %45 = vector.load %arg7[%c32_52, %c0_53] : memref<48x128xf32, #tpu.memory_space<vmem>>, vector<16x128xf32>
    tpu.vector_store %arg7[%c32_52, %c0_53], %44 {strides = array<i32>} : memref<48x128xf32, #tpu.memory_space<vmem>>, vector<16x128xf32>,
    %c24_54 = arith.constant 24 : index
    %c0_55 = arith.constant 0 : index
    %46 = vector.load %arg7[%c24_54, %c0_55] : memref<48x128xf32, #tpu.memory_space<vmem>>, vector<8x128xf32>
    tpu.vector_store %arg7[%c24_54, %c0_55], %32 {strides = array<i32>} : memref<48x128xf32, #tpu.memory_space<vmem>>, vector<8x128xf32>,
    %c0_56 = arith.constant 0 : index
    %c0_57 = arith.constant 0 : index
    %47 = vector.load %arg4[%c0_56, %c0_57] : memref<16x48xf32, #tpu.memory_space<vmem>>, vector<16x48xf32>
    %c0_58 = arith.constant 0 : index
    %c0_59 = arith.constant 0 : index
    %48 = vector.load %arg7[%c0_58, %c0_59] : memref<48x128xf32, #tpu.memory_space<vmem>>, vector<48x128xf32>
    %cst_60 = arith.constant dense<0.000000e+00> : vector<16x128xf32>
    %49 = tpu.matmul %47, %48, %cst_60 {dimension_numbers = #tpu.dot_dimension_numbers<[1], [0], [0], [1], [0, 0, 1, 1], [], []>} : vector<16x48xf32>, vector<48x128xf32>, vector<16x128xf32> -> vector<16x128xf32>
    %c0_61 = arith.constant 0 : index
    %c0_62 = arith.constant 0 : index
    %50 = vector.load %arg5[%c0_61, %c0_62] : memref<16x1xf32, #tpu.memory_space<vmem>>, vector<16x1xf32>
    %51 = vector.broadcast %50 : vector<16x1xf32> to vector<16x128xf32>
    %52 = arith.addf %49, %51 : vector<16x128xf32>
    %c0_63 = arith.constant 0 : index
    %53 = arith.index_cast %c1_i32 : i32 to index
    %c0_64 = arith.constant 0 : index
    %c0_65 = arith.constant 0 : index
    %54 = vector.load %arg6[%c0_63, %53, %c0_64, %c0_65] : memref<1x4x16x128xf32, #tpu.memory_space<vmem>>, vector<1x1x16x128xf32>
    %55 = vector.shape_cast %54 : vector<1x1x16x128xf32> to vector<16x128xf32>
    %56 = vector.shape_cast %52 : vector<16x128xf32> to vector<1x1x16x128xf32>
    tpu.vector_store %arg6[%c0_63, %53, %c0_64, %c0_65], %56 {strides = array<i32>} : memref<1x4x16x128xf32, #tpu.memory_space<vmem>>, vector<1x1x16x128xf32>,
    %c2_i32 = arith.constant 2 : i32
    %c0_66 = arith.constant 0 : index
    %57 = arith.index_cast %c2_i32 : i32 to index
    %c0_67 = arith.constant 0 : index
    %c0_68 = arith.constant 0 : index
    %58 = vector.load %arg2[%c0_66, %57, %c0_67, %c0_68] : memref<1x4x8x128xf32, #tpu.memory_space<vmem>>, vector<1x1x8x128xf32>
    %59 = vector.shape_cast %58 : vector<1x1x8x128xf32> to vector<8x128xf32>
    %c0_69 = arith.constant 0 : index
    %c0_70 = arith.constant 0 : index
    %60 = vector.load %arg7[%c0_69, %c0_70] : memref<48x128xf32, #tpu.memory_space<vmem>>, vector<16x128xf32>
    %c0_71 = arith.constant 0 : index
    %61 = arith.index_cast %c2_i32 : i32 to index
    %c0_72 = arith.constant 0 : index
    %c0_73 = arith.constant 0 : index
    %c0_74 = arith.constant 0 : index
    %62 = vector.load %arg3[%c0_71, %61, %c0_72, %c0_73, %c0_74] : memref<1x4x2x128x128xf32, #tpu.memory_space<vmem>>, vector<1x1x1x128x128xf32>
    %63 = vector.shape_cast %62 : vector<1x1x1x128x128xf32> to vector<128x128xf32>
    %cst_75 = arith.constant dense<0.000000e+00> : vector<16x128xf32>
    %64 = tpu.matmul %60, %63, %cst_75 {dimension_numbers = #tpu.dot_dimension_numbers<[1], [0], [0], [1], [0, 0, 1, 1], [], []>} : vector<16x128xf32>, vector<128x128xf32>, vector<16x128xf32> -> vector<16x128xf32>
    %c8_76 = arith.constant 8 : index
    %c0_77 = arith.constant 0 : index
    %65 = vector.load %arg7[%c8_76, %c0_77] : memref<48x128xf32, #tpu.memory_space<vmem>>, vector<16x128xf32>
    tpu.vector_store %arg7[%c8_76, %c0_77], %64 {strides = array<i32>} : memref<48x128xf32, #tpu.memory_space<vmem>>, vector<16x128xf32>,
    %c0_78 = arith.constant 0 : index
    %c0_79 = arith.constant 0 : index
    %66 = vector.load %arg7[%c0_78, %c0_79] : memref<48x128xf32, #tpu.memory_space<vmem>>, vector<8x128xf32>
    tpu.vector_store %arg7[%c0_78, %c0_79], %59 {strides = array<i32>} : memref<48x128xf32, #tpu.memory_space<vmem>>, vector<8x128xf32>,
    %c24_80 = arith.constant 24 : index
    %c0_81 = arith.constant 0 : index
    %67 = vector.load %arg7[%c24_80, %c0_81] : memref<48x128xf32, #tpu.memory_space<vmem>>, vector<16x128xf32>
    %c0_82 = arith.constant 0 : index
    %68 = arith.index_cast %c2_i32 : i32 to index
    %c1_83 = arith.constant 1 : index
    %c0_84 = arith.constant 0 : index
    %c0_85 = arith.constant 0 : index
    %69 = vector.load %arg3[%c0_82, %68, %c1_83, %c0_84, %c0_85] : memref<1x4x2x128x128xf32, #tpu.memory_space<vmem>>, vector<1x1x1x128x128xf32>
    %70 = vector.shape_cast %69 : vector<1x1x1x128x128xf32> to vector<128x128xf32>
    %cst_86 = arith.constant dense<0.000000e+00> : vector<16x128xf32>
    %71 = tpu.matmul %67, %70, %cst_86 {dimension_numbers = #tpu.dot_dimension_numbers<[1], [0], [0], [1], [0, 0, 1, 1], [], []>} : vector<16x128xf32>, vector<128x128xf32>, vector<16x128xf32> -> vector<16x128xf32>
    %c32_87 = arith.constant 32 : index
    %c0_88 = arith.constant 0 : index
    %72 = vector.load %arg7[%c32_87, %c0_88] : memref<48x128xf32, #tpu.memory_space<vmem>>, vector<16x128xf32>
    tpu.vector_store %arg7[%c32_87, %c0_88], %71 {strides = array<i32>} : memref<48x128xf32, #tpu.memory_space<vmem>>, vector<16x128xf32>,
    %c24_89 = arith.constant 24 : index
    %c0_90 = arith.constant 0 : index
    %73 = vector.load %arg7[%c24_89, %c0_90] : memref<48x128xf32, #tpu.memory_space<vmem>>, vector<8x128xf32>
    tpu.vector_store %arg7[%c24_89, %c0_90], %59 {strides = array<i32>} : memref<48x128xf32, #tpu.memory_space<vmem>>, vector<8x128xf32>,
    %c0_91 = arith.constant 0 : index
    %c0_92 = arith.constant 0 : index
    %74 = vector.load %arg4[%c0_91, %c0_92] : memref<16x48xf32, #tpu.memory_space<vmem>>, vector<16x48xf32>
    %c0_93 = arith.constant 0 : index
    %c0_94 = arith.constant 0 : index
    %75 = vector.load %arg7[%c0_93, %c0_94] : memref<48x128xf32, #tpu.memory_space<vmem>>, vector<48x128xf32>
    %cst_95 = arith.constant dense<0.000000e+00> : vector<16x128xf32>
    %76 = tpu.matmul %74, %75, %cst_95 {dimension_numbers = #tpu.dot_dimension_numbers<[1], [0], [0], [1], [0, 0, 1, 1], [], []>} : vector<16x48xf32>, vector<48x128xf32>, vector<16x128xf32> -> vector<16x128xf32>
    %c0_96 = arith.constant 0 : index
    %c0_97 = arith.constant 0 : index
    %77 = vector.load %arg5[%c0_96, %c0_97] : memref<16x1xf32, #tpu.memory_space<vmem>>, vector<16x1xf32>
    %78 = vector.broadcast %77 : vector<16x1xf32> to vector<16x128xf32>
    %79 = arith.addf %76, %78 : vector<16x128xf32>
    %c0_98 = arith.constant 0 : index
    %80 = arith.index_cast %c2_i32 : i32 to index
    %c0_99 = arith.constant 0 : index
    %c0_100 = arith.constant 0 : index
    %81 = vector.load %arg6[%c0_98, %80, %c0_99, %c0_100] : memref<1x4x16x128xf32, #tpu.memory_space<vmem>>, vector<1x1x16x128xf32>
    %82 = vector.shape_cast %81 : vector<1x1x16x128xf32> to vector<16x128xf32>
    %83 = vector.shape_cast %79 : vector<16x128xf32> to vector<1x1x16x128xf32>
    tpu.vector_store %arg6[%c0_98, %80, %c0_99, %c0_100], %83 {strides = array<i32>} : memref<1x4x16x128xf32, #tpu.memory_space<vmem>>, vector<1x1x16x128xf32>,
    %c3_i32 = arith.constant 3 : i32
    %c0_101 = arith.constant 0 : index
    %84 = arith.index_cast %c3_i32 : i32 to index
    %c0_102 = arith.constant 0 : index
    %c0_103 = arith.constant 0 : index
    %85 = vector.load %arg2[%c0_101, %84, %c0_102, %c0_103] : memref<1x4x8x128xf32, #tpu.memory_space<vmem>>, vector<1x1x8x128xf32>
    %86 = vector.shape_cast %85 : vector<1x1x8x128xf32> to vector<8x128xf32>
    %c0_104 = arith.constant 0 : index
    %c0_105 = arith.constant 0 : index
    %87 = vector.load %arg7[%c0_104, %c0_105] : memref<48x128xf32, #tpu.memory_space<vmem>>, vector<16x128xf32>
    %c0_106 = arith.constant 0 : index
    %88 = arith.index_cast %c3_i32 : i32 to index
    %c0_107 = arith.constant 0 : index
    %c0_108 = arith.constant 0 : index
    %c0_109 = arith.constant 0 : index
    %89 = vector.load %arg3[%c0_106, %88, %c0_107, %c0_108, %c0_109] : memref<1x4x2x128x128xf32, #tpu.memory_space<vmem>>, vector<1x1x1x128x128xf32>
    %90 = vector.shape_cast %89 : vector<1x1x1x128x128xf32> to vector<128x128xf32>
    %cst_110 = arith.constant dense<0.000000e+00> : vector<16x128xf32>
    %91 = tpu.matmul %87, %90, %cst_110 {dimension_numbers = #tpu.dot_dimension_numbers<[1], [0], [0], [1], [0, 0, 1, 1], [], []>} : vector<16x128xf32>, vector<128x128xf32>, vector<16x128xf32> -> vector<16x128xf32>
    %c8_111 = arith.constant 8 : index
    %c0_112 = arith.constant 0 : index
    %92 = vector.load %arg7[%c8_111, %c0_112] : memref<48x128xf32, #tpu.memory_space<vmem>>, vector<16x128xf32>
    tpu.vector_store %arg7[%c8_111, %c0_112], %91 {strides = array<i32>} : memref<48x128xf32, #tpu.memory_space<vmem>>, vector<16x128xf32>,
    %c0_113 = arith.constant 0 : index
    %c0_114 = arith.constant 0 : index
    %93 = vector.load %arg7[%c0_113, %c0_114] : memref<48x128xf32, #tpu.memory_space<vmem>>, vector<8x128xf32>
    tpu.vector_store %arg7[%c0_113, %c0_114], %86 {strides = array<i32>} : memref<48x128xf32, #tpu.memory_space<vmem>>, vector<8x128xf32>,
    %c24_115 = arith.constant 24 : index
    %c0_116 = arith.constant 0 : index
    %94 = vector.load %arg7[%c24_115, %c0_116] : memref<48x128xf32, #tpu.memory_space<vmem>>, vector<16x128xf32>
    %c0_117 = arith.constant 0 : index
    %95 = arith.index_cast %c3_i32 : i32 to index
    %c1_118 = arith.constant 1 : index
    %c0_119 = arith.constant 0 : index
    %c0_120 = arith.constant 0 : index
    %96 = vector.load %arg3[%c0_117, %95, %c1_118, %c0_119, %c0_120] : memref<1x4x2x128x128xf32, #tpu.memory_space<vmem>>, vector<1x1x1x128x128xf32>
    %97 = vector.shape_cast %96 : vector<1x1x1x128x128xf32> to vector<128x128xf32>
    %cst_121 = arith.constant dense<0.000000e+00> : vector<16x128xf32>
    %98 = tpu.matmul %94, %97, %cst_121 {dimension_numbers = #tpu.dot_dimension_numbers<[1], [0], [0], [1], [0, 0, 1, 1], [], []>} : vector<16x128xf32>, vector<128x128xf32>, vector<16x128xf32> -> vector<16x128xf32>
    %c32_122 = arith.constant 32 : index
    %c0_123 = arith.constant 0 : index
    %99 = vector.load %arg7[%c32_122, %c0_123] : memref<48x128xf32, #tpu.memory_space<vmem>>, vector<16x128xf32>
    tpu.vector_store %arg7[%c32_122, %c0_123], %98 {strides = array<i32>} : memref<48x128xf32, #tpu.memory_space<vmem>>, vector<16x128xf32>,
    %c24_124 = arith.constant 24 : index
    %c0_125 = arith.constant 0 : index
    %100 = vector.load %arg7[%c24_124, %c0_125] : memref<48x128xf32, #tpu.memory_space<vmem>>, vector<8x128xf32>
    tpu.vector_store %arg7[%c24_124, %c0_125], %86 {strides = array<i32>} : memref<48x128xf32, #tpu.memory_space<vmem>>, vector<8x128xf32>,
    %c0_126 = arith.constant 0 : index
    %c0_127 = arith.constant 0 : index
    %101 = vector.load %arg4[%c0_126, %c0_127] : memref<16x48xf32, #tpu.memory_space<vmem>>, vector<16x48xf32>
    %c0_128 = arith.constant 0 : index
    %c0_129 = arith.constant 0 : index
    %102 = vector.load %arg7[%c0_128, %c0_129] : memref<48x128xf32, #tpu.memory_space<vmem>>, vector<48x128xf32>
    %cst_130 = arith.constant dense<0.000000e+00> : vector<16x128xf32>
    %103 = tpu.matmul %101, %102, %cst_130 {dimension_numbers = #tpu.dot_dimension_numbers<[1], [0], [0], [1], [0, 0, 1, 1], [], []>} : vector<16x48xf32>, vector<48x128xf32>, vector<16x128xf32> -> vector<16x128xf32>
    %c0_131 = arith.constant 0 : index
    %c0_132 = arith.constant 0 : index
    %104 = vector.load %arg5[%c0_131, %c0_132] : memref<16x1xf32, #tpu.memory_space<vmem>>, vector<16x1xf32>
    %105 = vector.broadcast %104 : vector<16x1xf32> to vector<16x128xf32>
    %106 = arith.addf %103, %105 : vector<16x128xf32>
    %c0_133 = arith.constant 0 : index
    %107 = arith.index_cast %c3_i32 : i32 to index
    %c0_134 = arith.constant 0 : index
    %c0_135 = arith.constant 0 : index
    %108 = vector.load %arg6[%c0_133, %107, %c0_134, %c0_135] : memref<1x4x16x128xf32, #tpu.memory_space<vmem>>, vector<1x1x16x128xf32>
    %109 = vector.shape_cast %108 : vector<1x1x16x128xf32> to vector<16x128xf32>
    %110 = vector.shape_cast %106 : vector<16x128xf32> to vector<1x1x16x128xf32>
    tpu.vector_store %arg6[%c0_133, %107, %c0_134, %c0_135], %110 {strides = array<i32>} : memref<1x4x16x128xf32, #tpu.memory_space<vmem>>, vector<1x1x16x128xf32>,
    %c4_i32 = arith.constant 4 : i32
    return
  }
  func.func @transform_0(%arg0: i32, %arg1: i32) -> (i32, i32, i32, i32) {
    %c0_i32 = arith.constant 0 : i32
    %c0_i32_0 = arith.constant 0 : i32
    %c0_i32_1 = arith.constant 0 : i32
    return %arg0, %arg1, %c0_i32, %c0_i32_0 : i32, i32, i32, i32
  }
  func.func @transform_1(%arg0: i32, %arg1: i32) -> (i32, i32, i32, i32, i32) {
    %c0_i32 = arith.constant 0 : i32
    %c0_i32_0 = arith.constant 0 : i32
    %c0_i32_1 = arith.constant 0 : i32
    %c0_i32_2 = arith.constant 0 : i32
    return %arg0, %arg1, %c0_i32, %c0_i32_0, %c0_i32_1 : i32, i32, i32, i32, i32
  }
  func.func @transform_2(%arg0: i32, %arg1: i32) -> (i32, i32) {
    %c0_i32 = arith.constant 0 : i32
    %c0_i32_0 = arith.constant 0 : i32
    %c0_i32_1 = arith.constant 0 : i32
    return %c0_i32, %c0_i32_0 : i32, i32
  }
  func.func @transform_3(%arg0: i32, %arg1: i32) -> (i32, i32) {
    %c0_i32 = arith.constant 0 : i32
    %c0_i32_0 = arith.constant 0 : i32
    %c0_i32_1 = arith.constant 0 : i32
    return %c0_i32, %c0_i32_0 : i32, i32
  }
  func.func @transform_4(%arg0: i32, %arg1: i32) -> (i32, i32, i32, i32) {
    %c0_i32 = arith.constant 0 : i32
    %c0_i32_0 = arith.constant 0 : i32
    %c0_i32_1 = arith.constant 0 : i32
    return %arg0, %arg1, %c0_i32, %c0_i32_0 : i32, i32, i32, i32
  }
}

</mosaic_0001>

<bundles_post_ra>
// kernel: tpu_custom_call.1
= control target key start
LH: loop header
LB: loop body
LE: loop exit
PB: predicated region body
PF: predicated region fallthrough
CT: control target
= control target key end

     0   :  { %s1742_s0 = inlined_call_operand.hbm [shape: f32[2,4,8,128], index: 0, kind: input, shape index: {}]   ;;  %s1743_s1 = inlined_call_operand.hbm [shape: f32[2,4,2,128,128], index: 1, kind: input, shape index: {}]   ;;  %s1744_s2 = inlined_call_operand.vmem [shape: f32[16,48], index: 2, kind: input, shape index: {}]   ;;  %s1745_s3 = inlined_call_operand.vmem [shape: f32[16,1], index: 3, kind: input, shape index: {}]   ;;  %s1746_s4 = inlined_call_operand.hbm [shape: f32[2,4,16,128], index: 4, kind: output, shape index: {}]  }
   0x1   :  { %1748 = sst [smem:[#allocation13_spill]] %s1742_s0 }
   0x2   :  { %9 = vsyncpa [#allocation4], 0 }
   0x3   :  { %11 = vsyncpa [#allocation4 + $0x1], 0 }
   0x4   :  { %12 = vsyncpa [#allocation7], 0 }
   0x5   :  { %14 = vsyncpa [#allocation7 + $0x1], 0 }
   0x6   :  { %15 = vsyncpa [#allocation5], 0 }
   0x7   :  { %17 = vsyncpa [#allocation5 + $0x1], 0  ;;  %s1408_s15 = smov 0   ;;  %s1410_s16 = smov 0  }
   0x8   :  { %s1412_s17 = smov 0   ;;  %s1414_s18 = smov 0  }
   0x9   :  { %s1416_s19 = smov 0   ;;  %s1418_s20 = smov 0  }
   0xa LB: > { %s1002_s21 = sadd.s32 4294967295, %s1375_s20   ;;  %s1003_s22 = sadd.s32 4294967294, %s1375_s20   ;;  %s1375_s20 = sphi %s1418_s20, %s23_s20   ;;  %s1371_s19 = sphi %s1416_s19, %s1761_s19   ;;  %s1367_s18 = sphi %s1414_s18, %s1760_s18   ;;  %s1363_s17 = sphi %s1412_s17, %s1759_s17   ;;  %s1359_s16 = sphi %s1410_s16, %s1758_s16   ;;  %s1355_s15 = sphi %s1408_s15, %s1757_s15  }
   0xb   : > { %s35_s23 = sadd.s32 1, %s1371_s19  ;;  %s44_s24 = sadd.s32 1, %s1363_s17 }
   0xc   : > { %p37_p0 = scmp.ge.s32.totalorder %s35_s23, 2  ;;  %p51_p1 = scmp.ne.s32.totalorder %s1363_s17, %s1359_s16 }
   0xd   : > { %p52_p2 = scmp.eq.s32.totalorder %s1375_s20, 0  ;;  %p57_p3 = scmp.ne.s32.totalorder %s1359_s16, %s1355_s15 }
   0xe   : > { %s1763_s23 = smov (%p37_p0, %s35_s23), 0  ;;  %p58_p5 = scmp.eq.s32.totalorder %s1002_s21, 0 }
   0xf   : > { %1749 = sst [smem:[#allocation12_spill]] %s1763_s23  ;;  %p1449_p4 = por %p52_p2, %p51_p1 }
  0x10   : > { %s39_s26 = ssub.s32 %s1371_s19, %s1763_s23  ;;  %p153_p6 = scmp.eq.s32.totalorder %s1002_s21, 1 }
  0x11   : > { %p42_p7 = scmp.eq.s32.totalorder %s39_s26, 0  ;;  %p1455_p8 = por %p58_p5, %p57_p3 }
  0x12   : > { %p1459_p9 = por %p153_p6, %p51_p1  ;;  %p159_p10 = scmp.eq.s32.totalorder %s1003_s22, 1 }
  0x13   : > { %s1464_s29 = scalar_select %p42_p7, %s1363_s17, %s44_s24  }
  0x14   : > { %p1466_p11 = por %p159_p10, %p57_p3  ;;  %p1005_p12 = scmp.ge.s32.totalorder %s1375_s20, 2 }
  0x15   : > { %p1170_p13 = scmp.lt.s32.totalorder %s1375_s20, 2  ;;  %s1473_s5 = sand.u32 1, %s1363_s17  }
  0x16   : > { %s1006_s6 = sshll.u32 %s1473_s5, 5  ;;  %s1150_s7 = sshll.u32 %s1371_s19, 5 }
  0x17   : > { %s1754_s0 = sld [smem:[#allocation13_spill]]  ;;  %s189_s11 = scalar_lea.vmem [#allocation3], %s1006_s6 }
  0x18   : > { %s199_s12 = sshll.u32 %s189_s11, 4  ;;  %p1482_p0 = pnand %p1170_p13, %p1449_p4  ;;  %s200_s12 = int_to_ptr.vmem [resolvable:$true] %s199_s12 }
  0x19   : > { %p1012_p1 = scmp.ge.s32.totalorder %s1375_s20, 1  ;;  %s186_s21 = scalar_lea.sflag [#allocation4], %s1473_s5 }
  0x1a   : > { %s1377_s22 = smov 128   ;;  %s1378_s24 = smov 8  }
  0x1b   : > { %p232_p2 = scmp.lt.s32.totalorder %s1375_s20, 3  ;;  %s1009_s26 = sshll.u32 %s1473_s5, 10 }
  0x1c   : > { %s1151_s6 = sshll.u32 %s1371_s19, 10  ;;  %s213_s9 = scalar_lea.vmem [#allocation6], %s1009_s26 }
  0x1d   : > { %s196_s10 = scalar_lea.hbm %s1754_s0, %s1150_s7  ;;  %p233_p3 = pnand %p1012_p1, %p232_p2 }
  0x1e   : > { %s197_s13 = sshll.u32 %s196_s10, 4  ;;  %s221_s25 = scalar_lea.hbm %s1743_s1, %s1151_s6  ;;  %s198_s13 = int_to_ptr.hbm [resolvable:$true] %s197_s13 }
  0x1f   : > { %1162 = dma.hbm_to_vmem [thread:$0]  (!%p1482_p0), %s198_s13, 512, %s200_s12, %s186_s21, %s1377_s22, %s1377_s22, %s1378_s24  }
  0x20   : > { %s224_s10 = sshll.u32 %s213_s9, 4  ;;  %s222_s11 = sshll.u32 %s221_s25, 4  ;;  %s225_s10 = int_to_ptr.vmem [resolvable:$true] %s224_s10  ;;  %s223_s11 = int_to_ptr.hbm [resolvable:$true] %s222_s11 }
  0x21   : > { %s210_s0 = scalar_lea.sflag [#allocation7], %s1473_s5  ;;  %236 = sbr.rel (%p233_p3) target bundleno = 837 (0x345), region = 36 }
  0x22   : > { %1165 = dma.hbm_to_vmem [thread:$0]  (!%p1482_p0), %s223_s11, 16384, %s225_s10, %s210_s0, %s1377_s22, %s1377_s22, %s1378_s24  }
  0x23   : > { %s1500_s12 = sand.u32 (!%p233_p3), 1, %s1359_s16  }
  0x24   : > { %s1013_s13 = sshll.u32 (!%p233_p3), %s1500_s12, 5  ;;  %s239_s21 = scalar_lea.sflag (!%p233_p3), [#allocation4], %s1500_s12 }
  0x25   : > { %s1504_s23 = scalar_lea.vmem (!%p233_p3), [#allocation3], %s1013_s13 }
  0x26   : > { %1342 = dma.done.wait (%p1455_p8), %s239_s21, 512  }
  0x27   : > { %1344 = vsyncadd (%p1455_p8), %s239_s21, 4294966784  ;;  %s1014_s0 = sshll.u32 %s1500_s12, 10  ;;  %s249_s5 = scalar_lea.sflag [#allocation7], %s1500_s12 }
  0x28   : > { %s1512_s14 = scalar_lea.vmem [#allocation6], %s1014_s0 }
  0x29   : > { %1346 = dma.done.wait (%p1455_p8), %s249_s5, 16384  }
  0x2a   : > { %1348 = vsyncadd (%p1455_p8), %s249_s5, 4294950912  ;;  %v1031_v0 = vld [vmem:[%s1512_s14 + $0xf8] sm:$0xff]  ;;  %v1030_v1 = vld [vmem:[%s1512_s14 + $0xf0] sm:$0xff]  ;;  %v1379_v44 = vmov 0.0   ;;  %vm406_vm0 = vcmask 392192   ;;  %v1380_v57 = vmov 0  }
  0x2b   : > { %360 = vmatpush.msra.mxu1 %v1031_v0  ;;  %v314_v2 = vld [vmem:[%s1512_s14 + $0x78] sm:$0xff]  ;;  %v313_v3 = vld [vmem:[%s1512_s14 + $0x70] sm:$0xff]  ;;  %v1029_v4 = vld [vmem:[%s1512_s14 + $0xe8] sm:$0xff]  ;;  %1226 = vset.pattern.permute.xlu0 %v1380_v57  ;;  %s1015_s9 = sshll.u32 %s1500_s12, 6  ;;  %s1152_s11 = sshll.u32 %s1367_s18, 6 }
  0x2c   : > { %315 = vmatpush.msra.mxu0 %v314_v2  ;;  %v312_v5 = vld [vmem:[%s1512_s14 + $0x68] sm:$0xff]  ;;  %v1028_v6 = vld [vmem:[%s1512_s14 + $0xe0] sm:$0xff]  ;;  %v1027_v8 = vld [vmem:[%s1512_s14 + $0xd8] sm:$0xff]  ;;  %1227 = vset.pattern.permute.xlu1 %v1380_v57  ;;  %s1647_s10 = scalar_lea.vmem [#allocation8], %s1015_s9  ;;  %s885_s21 = scalar_lea.hbm %s1746_s4, %s1152_s11 }
  0x2d   : > { %361 = vmatpush.msra.mxu1 %v1030_v1  ;;  %v311_v7 = vld [vmem:[%s1512_s14 + $0x60] sm:$0xff]  ;;  %v310_v9 = vld [vmem:[%s1512_s14 + $0x58] sm:$0xff]  ;;  %v1026_v10 = vld [vmem:[%s1512_s14 + $0xd0] sm:$0xff]  ;;  %1228 = vset.pattern.permute.xlu2 %v1380_v57  ;;  %s886_s0 = sshll.u32 %s1647_s10, 4  ;;  %s888_s5 = sshll.u32 %s885_s21, 4  ;;  %s887_s0 = int_to_ptr.vmem [resolvable:$true] %s886_s0  ;;  %s889_s5 = int_to_ptr.hbm [resolvable:$true] %s888_s5 }
  0x2e   : > { %316 = vmatpush.msra.mxu0 %v313_v3  ;;  %v309_v11 = vld [vmem:[%s1512_s14 + $0x50] sm:$0xff]  ;;  %v1025_v12 = vld [vmem:[%s1512_s14 + $0xc8] sm:$0xff]  ;;  %v1066_v13 = vld [vmem:[%s1512_s14 + $0x1f8] sm:$0xff]  ;;  %s1303_s27 = sshra.s32 %s889_s5, 4  ;;  %s1309_s26 = scalar_lea.hbm %s1746_s4, 128  ;;  %s1304_s27 = int_to_ptr.hbm [resolvable:$true] %s1303_s27 }
  0x2f   : > { %362 = vmatpush.msra.mxu1 %v1029_v4  ;;  %v308_v14 = vld [vmem:[%s1512_s14 + $0x48] sm:$0xff]  ;;  %504 = vmatpush.msra.mxu2 %v1066_v13  ;;  %v1065_v15 = vld [vmem:[%s1512_s14 + $0x1f0] sm:$0xff]  ;;  %v1024_v16 = vld [vmem:[%s1512_s14 + $0xc0] sm:$0xff]  ;;  %s1305_s18 = scalar_lea.hbm %s1304_s27, 64  ;;  %p1310_p7 = scmp.lt.s32.totalorder %s1304_s27, %s1746_s4 }
  0x30   : > { %317 = vmatpush.msra.mxu0 %v312_v5  ;;  %v1064_v17 = vld [vmem:[%s1512_s14 + $0x1e8] sm:$0xff]  ;;  %v307_v18 = vld [vmem:[%s1512_s14 + $0x40] sm:$0xff]  ;;  %v1023_v19 = vld [vmem:[%s1512_s14 + $0xb8] sm:$0xff]  ;;  %p1306_p4 = scmp.ne.s32.totalorder %s1304_s27, %s1305_s18  ;;  %p1311_p8 = scmp.lt.s32.totalorder %s1309_s26, %s1305_s18 }
  0x31   : > { %363 = vmatpush.msra.mxu1 %v1028_v6  ;;  %505 = vmatpush.msra.mxu2 %v1065_v15  ;;  %v1063_v20 = vld [vmem:[%s1512_s14 + $0x1e0] sm:$0xff]  ;;  %v306_v21 = vld [vmem:[%s1512_s14 + $0x38] sm:$0xff]  ;;  %v1022_v22 = vld [vmem:[%s1512_s14 + $0xb0] sm:$0xff] }
  0x32   : > { %318 = vmatpush.msra.mxu0 %v311_v7  ;;  %v1062_v23 = vld [vmem:[%s1512_s14 + $0x1d8] sm:$0xff]  ;;  %v305_v24 = vld [vmem:[%s1512_s14 + $0x30] sm:$0xff]  ;;  %v1021_v25 = vld [vmem:[%s1512_s14 + $0xa8] sm:$0xff]  ;;  %p1307_p5 = pnand %p1306_p4, %p1459_p9  ;;  %p1312_p10 = por %p1311_p8, %p1310_p7 }
  0x33   : > { %364 = vmatpush.msra.mxu1 %v1027_v8  ;;  %506 = vmatpush.msra.mxu2 %v1064_v17  ;;  %v1061_v26 = vld [vmem:[%s1512_s14 + $0x1d0] sm:$0xff]  ;;  %v304_v27 = vld [vmem:[%s1512_s14 + $0x28] sm:$0xff]  ;;  %v1020_v28 = vld [vmem:[%s1512_s14 + $0xa0] sm:$0xff] }
  0x34   : > { %319 = vmatpush.msra.mxu0 %v310_v9  ;;  %v1060_v29 = vld [vmem:[%s1512_s14 + $0x1c8] sm:$0xff]  ;;  %v303_v30 = vld [vmem:[%s1512_s14 + $0x20] sm:$0xff]  ;;  %v1019_v31 = vld [vmem:[%s1512_s14 + $0x98] sm:$0xff]  ;;  %p1308_p6 = pneg %p1307_p5 }
  0x35   : > { %365 = vmatpush.msra.mxu1 %v1026_v10  ;;  %507 = vmatpush.msra.mxu2 %v1063_v20  ;;  %v1059_v32 = vld [vmem:[%s1512_s14 + $0x1c0] sm:$0xff]  ;;  %v302_v33 = vld [vmem:[%s1512_s14 + $0x18] sm:$0xff]  ;;  %v1018_v34 = vld [vmem:[%s1512_s14 + $0x90] sm:$0xff] }
  0x36   : > { %320 = vmatpush.msra.mxu0 %v309_v11  ;;  %v1058_v35 = vld [vmem:[%s1512_s14 + $0x1b8] sm:$0xff]  ;;  %v301_v36 = vld [vmem:[%s1512_s14 + $0x10] sm:$0xff]  ;;  %v1017_v37 = vld [vmem:[%s1512_s14 + $0x88] sm:$0xff]  ;;  %p1313_p13 = pnand %p1312_p10, %p1308_p6 }
  0x37   : > { %366 = vmatpush.msra.mxu1 %v1025_v12  ;;  %508 = vmatpush.msra.mxu2 %v1062_v23  ;;  %v1057_v38 = vld [vmem:[%s1512_s14 + $0x1b0] sm:$0xff]  ;;  %v300_v39 = vld [vmem:[%s1512_s14 + $0x8] sm:$0xff]  ;;  %v1016_v40 = vld [vmem:[%s1512_s14 + $0x80] sm:$0xff] }
  0x38   : > { %321 = vmatpush.msra.mxu0 %v308_v14  ;;  %v1056_v41 = vld [vmem:[%s1512_s14 + $0x1a8] sm:$0xff]  ;;  %v299_v42 = vld [vmem:[%s1512_s14] sm:$0xff]  ;;  %v1054_v45 = vld [vmem:[%s1512_s14 + $0x198] sm:$0xff] }
  0x39   : > { %367 = vmatpush.msra.mxu1 %v1024_v16  ;;  %509 = vmatpush.msra.mxu2 %v1061_v26  ;;  %v1055_v43 = vld [vmem:[%s1512_s14 + $0x1a0] sm:$0xff]  ;;  %v1053_v46 = vld [vmem:[%s1512_s14 + $0x190] sm:$0xff]  ;;  %v1052_v47 = vld [vmem:[%s1512_s14 + $0x188] sm:$0xff] }
  0x3a   : > { %322 = vmatpush.msra.mxu0 %v307_v18  ;;  %v1051_v48 = vld [vmem:[%s1512_s14 + $0x180] sm:$0xff]  ;;  %v1050_v54 = vld [vmem:[%s1512_s14 + $0x178] sm:$0xff]  ;;  %v1049_v56 = vld [vmem:[%s1512_s14 + $0x170] sm:$0xff] }
  0x3b   : > { %368 = vmatpush.msra.mxu1 %v1023_v19  ;;  %510 = vmatpush.msra.mxu2 %v1060_v29  ;;  %v1567_v49 = vld [vmem:[%s1504_s23] sm:$0xff]  ;;  %v1048_v59 = vld [vmem:[%s1512_s14 + $0x168] sm:$0xff]  ;;  %v1046_v61 = vld [vmem:[%s1512_s14 + $0x158] sm:$0xff] }
  0x3c   : > { %323 = vmatpush.msra.mxu0 %v306_v21  ;;  %v1578_v55 = vld [vmem:[%s1744_s2] sm:$0xff]  ;;  %v1593_v62 = vld [vmem:[%s1744_s2 + $0x8] sm:$0xff]  ;;  %v1045_v63 = vld [vmem:[%s1512_s14 + $0x150] sm:$0xff] }
  0x3d   : > { %369 = vmatpush.msra.mxu1 %v1022_v22  ;;  %511 = vmatpush.msra.mxu2 %v1059_v32  ;;  %v394_v58 = vld [vmem:[%s1745_s3] sm:$0xff]  ;;  %v395_v0 = vld [vmem:[%s1745_s3 + $0x8] sm:$0xff]  ;;  %v1042_v3 = vld [vmem:[%s1512_s14 + $0x138] sm:$0xff] }
  0x3e   : > { %324 = vmatpush.msra.mxu0 %v305_v24  ;;  %398 = vperm.xlu0 %1226, %v394_v58   ;;  %v1047_v60 = vld [vmem:[%s1512_s14 + $0x160] sm:$0xff]  ;;  %v1044_v1 = vld [vmem:[%s1512_s14 + $0x148] sm:$0xff]  ;;  %v1041_v4 = vld [vmem:[%s1512_s14 + $0x130] sm:$0xff] }
  0x3f   : > { %370 = vmatpush.msra.mxu1 %v1021_v25  ;;  %512 = vmatpush.msra.mxu2 %v1058_v35  ;;  %v1043_v2 = vld [vmem:[%s1512_s14 + $0x140] sm:$0xff]  ;;  %v1040_v5 = vld [vmem:[%s1512_s14 + $0x128] sm:$0xff]  ;;  %v1038_v7 = vld [vmem:[%s1512_s14 + $0x118] sm:$0xff] }
  0x40   : > { %325 = vmatpush.msra.mxu0 %v304_v27  ;;  %542 = vperm.xlu1 %1227, %v394_v58   ;;  %v1039_v6 = vld [vmem:[%s1512_s14 + $0x120] sm:$0xff]  ;;  %v1037_v8 = vld [vmem:[%s1512_s14 + $0x110] sm:$0xff]  ;;  %v1036_v9 = vld [vmem:[%s1512_s14 + $0x108] sm:$0xff] }
  0x41   : > { %371 = vmatpush.msra.mxu1 %v1020_v28  ;;  %513 = vmatpush.msra.mxu2 %v1057_v38  ;;  %v1035_v10 = vld [vmem:[%s1512_s14 + $0x100] sm:$0xff]  ;;  %v1103_v11 = vld [vmem:[%s1512_s14 + $0x2f8] sm:$0xff]  ;;  %v1102_v12 = vld [vmem:[%s1512_s14 + $0x2f0] sm:$0xff] }
  0x42   : > { %326 = vmatpush.msra.mxu0 %v303_v30  ;;  %686 = vperm.xlu2 %1228, %v394_v58   ;;  %v1101_v13 = vld [vmem:[%s1512_s14 + $0x2e8] sm:$0xff]  ;;  %v1100_v14 = vld [vmem:[%s1512_s14 + $0x2e0] sm:$0xff]  ;;  %v1099_v15 = vld [vmem:[%s1512_s14 + $0x2d8] sm:$0xff] }
  0x43   : > { %372 = vmatpush.msra.mxu1 %v1019_v31  ;;  %514 = vmatpush.msra.mxu2 %v1056_v41  ;;  %v1098_v16 = vld [vmem:[%s1512_s14 + $0x2d0] sm:$0xff]  ;;  %v1097_v17 = vld [vmem:[%s1512_s14 + $0x2c8] sm:$0xff]  ;;  %v1096_v18 = vld [vmem:[%s1512_s14 + $0x2c0] sm:$0xff] }
  0x44   : > { %327 = vmatpush.msra.mxu0 %v302_v33  ;;  %v1087_v19 = vld [vmem:[%s1512_s14 + $0x278] sm:$0xff]  ;;  %v1086_v21 = vld [vmem:[%s1512_s14 + $0x270] sm:$0xff]  ;;  %v1085_v22 = vld [vmem:[%s1512_s14 + $0x268] sm:$0xff] }
  0x45   : > { %373 = vmatpush.msra.mxu1 %v1018_v34  ;;  %515 = vmatpush.msra.mxu2 %v1055_v43  ;;  %v1095_v20 = vld [vmem:[%s1512_s14 + $0x2b8] sm:$0xff]  ;;  %v1094_v23 = vld [vmem:[%s1512_s14 + $0x2b0] sm:$0xff]  ;;  %v1084_v24 = vld [vmem:[%s1512_s14 + $0x260] sm:$0xff] }
  0x46   : > { %328 = vmatpush.msra.mxu0 %v301_v36  ;;  %403 = vperm.xlu0 %1226, %v395_v0   ;;  %v1093_v25 = vld [vmem:[%s1512_s14 + $0x2a8] sm:$0xff]  ;;  %v1083_v26 = vld [vmem:[%s1512_s14 + $0x258] sm:$0xff]  ;;  %v1092_v27 = vld [vmem:[%s1512_s14 + $0x2a0] sm:$0xff] }
  0x47   : > { %374 = vmatpush.msra.mxu1 %v1017_v37  ;;  %516 = vmatpush.msra.mxu2 %v1054_v45  ;;  %v1082_v28 = vld [vmem:[%s1512_s14 + $0x250] sm:$0xff]  ;;  %v1091_v29 = vld [vmem:[%s1512_s14 + $0x298] sm:$0xff]  ;;  %v1081_v30 = vld [vmem:[%s1512_s14 + $0x248] sm:$0xff] }
  0x48   : > { %329 = vmatpush.msra.mxu0 %v300_v39  ;;  %547 = vperm.xlu1 %1227, %v395_v0   ;;  %v1090_v31 = vld [vmem:[%s1512_s14 + $0x290] sm:$0xff]  ;;  %v1080_v32 = vld [vmem:[%s1512_s14 + $0x240] sm:$0xff]  ;;  %v1089_v33 = vld [vmem:[%s1512_s14 + $0x288] sm:$0xff] }
  0x49   : > { %375 = vmatpush.msra.mxu1 %v1016_v40  ;;  %517 = vmatpush.msra.mxu2 %v1053_v46  ;;  %v1079_v34 = vld [vmem:[%s1512_s14 + $0x238] sm:$0xff]  ;;  %v1088_v35 = vld [vmem:[%s1512_s14 + $0x280] sm:$0xff]  ;;  %v1034_v36 = vld [vmem:[%s1504_s23 + $0x8] sm:$0xff] }
  0x4a   : > { %376 = vmatmul.f32.vlgmr.msra.gmra.mxu1 %v1379_v44  ;;  %330 = vmatpush.msra.mxu0 %v299_v42  ;;  %v1078_v37 = vld [vmem:[%s1512_s14 + $0x230] sm:$0xff]  ;;  %v1077_v38 = vld [vmem:[%s1512_s14 + $0x228] sm:$0xff]  ;;  %v1076_v40 = vld [vmem:[%s1512_s14 + $0x220] sm:$0xff] }
  0x4b   : > { %331 = vmatmul.f32.vlgmr.msra.gmra.mxu0 %v1379_v44  ;;  %518 = vmatpush.msra.mxu2 %v1052_v47  ;;  %v1075_v41 = vld [vmem:[%s1512_s14 + $0x218] sm:$0xff]  ;;  %v1074_v42 = vld [vmem:[%s1512_s14 + $0x210] sm:$0xff]  ;;  %v1073_v43 = vld [vmem:[%s1512_s14 + $0x208] sm:$0xff] }
  0x4c   : > { %691 = vperm.xlu2 %1228, %v395_v0   ;;  %603 = vmatpush.msrb.mxu1 %v1087_v19  ;;  %v1122_v57 = vld [vmem:[%s1512_s14 + $0x368] sm:$0xff] }
  0x4d   : > { %519 = vmatpush.msra.mxu2 %v1051_v48  ;;  %v1134_v19 = vld [vmem:[%s1512_s14 + $0x3c8] sm:$0xff] }
  0x4e   : > { %520 = vmatmul.f32.vlgmr.msra.gmra.mxu2 %v1567_v49  ;;  %830 = vperm.xlu0 %1226, %v394_v58   ;;  %v1121_v58 = vld [vmem:[%s1512_s14 + $0x360] sm:$0xff] }
  0x4f   : > { %604 = vmatpush.msrb.mxu1 %v1086_v21  ;;  %v1132_v21 = vld [vmem:[%s1512_s14 + $0x3b8] sm:$0xff] }
  0x50   : > { %835 = vperm.xlu1 %1227, %v395_v0   ;;  %v1116_v0 = vld [vmem:[%s1512_s14 + $0x338] sm:$0xff] }
  0x51   : > { %605 = vmatpush.msrb.mxu1 %v1085_v22  ;;  %v1131_v22 = vld [vmem:[%s1512_s14 + $0x3b0] sm:$0xff] }
  0x52   : > { %379 = vmatmul.f32.gmra.mxu1 %v1379_v44 }
  0x53   : > { %334 = vmatmul.f32.gmra.mxu0 %v1379_v44  ;;  %606 = vmatpush.msrb.mxu1 %v1084_v24  ;;  %v1072_v44 = vld [vmem:[%s1512_s14 + $0x200] sm:$0xff] }
  0x54   : > { %v1129_v24 = vld [vmem:[%s1512_s14 + $0x3a0] sm:$0xff] }
  0x55   : > { %607 = vmatpush.msrb.mxu1 %v1083_v26  ;;  %v1127_v26 = vld [vmem:[%s1512_s14 + $0x390] sm:$0xff] }
  0x57   : > { %608 = vmatpush.msrb.mxu1 %v1082_v28  ;;  %v1125_v28 = vld [vmem:[%s1512_s14 + $0x380] sm:$0xff] }
  0x59   : > { %609 = vmatpush.msrb.mxu1 %v1081_v30 }
  0x5b   : > { %610 = vmatpush.msrb.mxu1 %v1080_v32 }
  0x5d   : > { %611 = vmatpush.msrb.mxu1 %v1079_v34 }
  0x5f   : > { %612 = vmatpush.msrb.mxu1 %v1078_v37 }
  0x61   : > { %613 = vmatpush.msrb.mxu1 %v1077_v38 }
  0x63   : > { %614 = vmatpush.msrb.mxu1 %v1076_v40 }
  0x65   : > { %615 = vmatpush.msrb.mxu1 %v1075_v41 }
  0x67   : > { %616 = vmatpush.msrb.mxu1 %v1074_v42 }
  0x69   : > { %617 = vmatpush.msrb.mxu1 %v1073_v43 }
  0x6b   : > { %618 = vmatpush.msrb.mxu1 %v1072_v44  ;;  %v1108_v44 = vld [vmem:[%s1504_s23 + $0x18] sm:$0xff] }
  0x6c   : > { %619 = vmatmul.f32.vlgmr.msrb.gmra.mxu1 %v1034_v36 }
  0xb0   : > { %v399_v46 = vpop.permute.xlu0 %398 }
  0xb2   : > { %v543_v30 = vpop.permute.xlu1 %542 }
  0xc7   : > { %v377_v50 = vpop.f32.mrf.mxu1 }
  0xc8   : > { %523 = vmatmul.f32.gmra.mxu2 %v377_v50  ;;  %v1570_v51 = vpop.f32.mrf.mxu0 }
  0xcf   : > { %v380_v52 = vpop.f32.mrf.mxu1 }
  0xd0   : > { %423 = vmatpush.msra.mxu3 %v380_v52  ;;  %v335_v53 = vpop.f32.mrf.mxu0 }
  0xd1   : > { %v521_v39 = vpop.f32.mrf.mxu2 }
  0xd2   : > { %424 = vmatpush.msra.mxu3 %v377_v50 }
  0xd4   : > { %425 = vmatpush.msra.mxu3 %v1567_v49 }
  0xd6   : > { %426 = vmatpush.msra.mxu3 %v335_v53 }
  0xd8   : > { %427 = vmatpush.msra.mxu3 %v1570_v51 }
  0xda   : > { %428 = vmatpush.msra.mxu3 %v1567_v49 }
  0xdb   : > { %1032 = vmatmul.msk.f32.vlgmr.msra.gmra.mxu3 %vm406_vm0, %v1578_v55 }
  0xdc   : > { %459 = vmatpush.msrb.mxu3 %v1050_v54  ;;  %v1124_v54 = vld [vmem:[%s1512_s14 + $0x378] sm:$0xff] }
  0xde   : > { %460 = vmatpush.msrb.mxu3 %v1049_v56  ;;  %v1123_v56 = vld [vmem:[%s1512_s14 + $0x370] sm:$0xff] }
  0xe0   : > { %461 = vmatpush.msrb.mxu3 %v1048_v59  ;;  %v1120_v59 = vld [vmem:[%s1512_s14 + $0x358] sm:$0xff] }
  0xe2   : > { %462 = vmatpush.msrb.mxu3 %v1047_v60  ;;  %v1119_v60 = vld [vmem:[%s1512_s14 + $0x350] sm:$0xff] }
  0xe3   : > { %1033 = vmatmul.msk.f32.gmra.mxu3 %vm406_vm0, %v1593_v62 }
  0xe4   : > { %463 = vmatpush.msrb.mxu3 %v1046_v61  ;;  %v1118_v61 = vld [vmem:[%s1512_s14 + $0x348] sm:$0xff] }
  0xe6   : > { %464 = vmatpush.msrb.mxu3 %v1045_v63  ;;  %v1117_v63 = vld [vmem:[%s1512_s14 + $0x340] sm:$0xff] }
  0xe8   : > { %465 = vmatpush.msrb.mxu3 %v1044_v1  ;;  %v1115_v1 = vld [vmem:[%s1512_s14 + $0x330] sm:$0xff] }
  0xea   : > { %466 = vmatpush.msrb.mxu3 %v1043_v2  ;;  %v1114_v2 = vld [vmem:[%s1512_s14 + $0x328] sm:$0xff] }
  0xec   : > { %467 = vmatpush.msrb.mxu3 %v1042_v3  ;;  %v1113_v3 = vld [vmem:[%s1512_s14 + $0x320] sm:$0xff] }
  0xee   : > { %468 = vmatpush.msrb.mxu3 %v1041_v4  ;;  %v1112_v4 = vld [vmem:[%s1512_s14 + $0x318] sm:$0xff] }
  0xf0   : > { %469 = vmatpush.msrb.mxu3 %v1040_v5  ;;  %v1111_v5 = vld [vmem:[%s1512_s14 + $0x310] sm:$0xff] }
  0xf2   : > { %470 = vmatpush.msrb.mxu3 %v1039_v6  ;;  %v1110_v6 = vld [vmem:[%s1512_s14 + $0x308] sm:$0xff] }
  0xf4   : > { %471 = vmatpush.msrb.mxu3 %v1038_v7  ;;  %v1109_v7 = vld [vmem:[%s1512_s14 + $0x300] sm:$0xff] }
  0xf6   : > { %472 = vmatpush.msrb.mxu3 %v1037_v8  ;;  %v1071_v8 = vld [vmem:[%s1504_s23 + $0x10] sm:$0xff] }
  0xf8   : > { %473 = vmatpush.msrb.mxu3 %v1036_v9 }
  0xfa   : > { %474 = vmatpush.msrb.mxu3 %v1035_v10  ;;  %v620_v10 = vpop.f32.mrf.mxu1 }
  0xfb   : > { %475 = vmatmul.f32.vlgmr.msrb.gmra.mxu3 %v1567_v49  ;;  %v404_v49 = vpop.permute.xlu0 %403 }
  0xfc   : > { %648 = vmatpush.msra.mxu3 %v1103_v11 }
  0xfe   : > { %649 = vmatpush.msra.mxu3 %v1102_v12 }
 0x100   : > { %650 = vmatpush.msra.mxu3 %v1101_v13  ;;  %v1140_v13 = vld [vmem:[%s1512_s14 + $0x3f8] sm:$0xff] }
 0x102   : > { %651 = vmatpush.msra.mxu3 %v1100_v14  ;;  %v1139_v14 = vld [vmem:[%s1512_s14 + $0x3f0] sm:$0xff] }
 0x103   : > { %478 = vmatmul.f32.gmra.mxu3 %v1570_v51 }
 0x104   : > { %652 = vmatpush.msra.mxu3 %v1099_v15  ;;  %v1138_v15 = vld [vmem:[%s1512_s14 + $0x3e8] sm:$0xff] }
 0x106   : > { %653 = vmatpush.msra.mxu3 %v1098_v16  ;;  %v1137_v16 = vld [vmem:[%s1512_s14 + $0x3e0] sm:$0xff] }
 0x108   : > { %654 = vmatpush.msra.mxu3 %v1097_v17  ;;  %v1136_v17 = vld [vmem:[%s1512_s14 + $0x3d8] sm:$0xff] }
 0x10a   : > { %655 = vmatpush.msra.mxu3 %v1096_v18  ;;  %v1135_v18 = vld [vmem:[%s1512_s14 + $0x3d0] sm:$0xff] }
 0x10c   : > { %656 = vmatpush.msra.mxu3 %v1095_v20  ;;  %v1133_v20 = vld [vmem:[%s1512_s14 + $0x3c0] sm:$0xff] }
 0x10e   : > { %657 = vmatpush.msra.mxu3 %v1094_v23  ;;  %v1130_v23 = vld [vmem:[%s1512_s14 + $0x3a8] sm:$0xff] }
 0x110   : > { %658 = vmatpush.msra.mxu3 %v1093_v25  ;;  %v1128_v25 = vld [vmem:[%s1512_s14 + $0x398] sm:$0xff] }
 0x112   : > { %659 = vmatpush.msra.mxu3 %v1092_v27  ;;  %v1126_v27 = vld [vmem:[%s1512_s14 + $0x388] sm:$0xff]  ;;  %s871_s14 = scalar_lea.sflag [#allocation5], %s1500_s12 }
 0x114   : > { %660 = vmatpush.msra.mxu3 %v1091_v29 }
 0x116   : > { %661 = vmatpush.msra.mxu3 %v1090_v31 }
 0x118   : > { %662 = vmatpush.msra.mxu3 %v1089_v33  ;;  %v548_v33 = vpop.permute.xlu1 %547 }
 0x11a   : > { %663 = vmatpush.msra.mxu3 %v1088_v35  ;;  %v687_v35 = vpop.permute.xlu2 %686 }
 0x11b   : > { %664 = vmatmul.f32.vlgmr.msra.gmra.mxu3 %v1034_v36 }
 0x122   : > { %v692_v38 = vpop.permute.xlu2 %691 }
 0x123   : > { %667 = vmatmul.f32.gmra.mxu3 %v521_v39 }
 0x14b   : > { %v524_v45 = vpop.f32.mrf.mxu2 }
 0x14c   : > { %566 = vmatpush.msrb.mxu0 %v524_v45 }
 0x14e   : > { %567 = vmatpush.msrb.mxu0 %v521_v39 }
 0x150   : > { %568 = vmatpush.msrb.mxu0 %v1034_v36 }
 0x15e   : > { %v430_v47 = vpop.f32.mrf.mxu3 }
 0x15f   : > { %v431_v48 = vadd.f32 %v430_v47, %v399_v46  ;;  %v831_v46 = vpop.permute.xlu0 %830 }
 0x161   : > { %436 = vst [vmem:[%s1647_s10] sm:$0xff] %v431_v48 }
 0x166   : > { %v433_v50 = vpop.f32.mrf.mxu3 }
 0x167   : > { %v434_v51 = vadd.f32 %v433_v50, %v404_v49  ;;  %v836_v49 = vpop.permute.xlu1 %835 }
 0x169   : > { %437 = vst [vmem:[%s1647_s10 + $0x8] sm:$0xff] %v434_v51 }
 0x17e   : > { %v476_v52 = vpop.f32.mrf.mxu3 }
 0x17f   : > { %622 = vmatmul.f32.gmra.mxu1 %v476_v52 }
 0x186   : > { %v479_v53 = vpop.f32.mrf.mxu3 }
 0x187   : > { %569 = vmatpush.msrb.mxu0 %v479_v53 }
 0x189   : > { %570 = vmatpush.msrb.mxu0 %v476_v52 }
 0x18b   : > { %571 = vmatpush.msrb.mxu0 %v1034_v36 }
 0x18c   : > { %1067 = vmatmul.msk.f32.vlgmr.msrb.gmra.mxu0 %vm406_vm0, %v1578_v55 }
 0x18d   : > { %747 = vmatpush.msra.mxu0 %v1124_v54 }
 0x18f   : > { %748 = vmatpush.msra.mxu0 %v1123_v56 }
 0x191   : > { %749 = vmatpush.msra.mxu0 %v1122_v57 }
 0x193   : > { %750 = vmatpush.msra.mxu0 %v1121_v58 }
 0x194   : > { %1068 = vmatmul.msk.f32.gmra.mxu0 %vm406_vm0, %v1593_v62 }
 0x195   : > { %751 = vmatpush.msra.mxu0 %v1120_v59 }
 0x197   : > { %752 = vmatpush.msra.mxu0 %v1119_v60 }
 0x199   : > { %753 = vmatpush.msra.mxu0 %v1118_v61 }
 0x19b   : > { %754 = vmatpush.msra.mxu0 %v1117_v63 }
 0x19d   : > { %755 = vmatpush.msra.mxu0 %v1116_v0 }
 0x19e   : > { %v665_v9 = vpop.f32.mrf.mxu3 }
 0x19f   : > { %756 = vmatpush.msra.mxu0 %v1115_v1 }
 0x1a1   : > { %757 = vmatpush.msra.mxu0 %v1114_v2 }
 0x1a3   : > { %758 = vmatpush.msra.mxu0 %v1113_v3 }
 0x1a5   : > { %759 = vmatpush.msra.mxu0 %v1112_v4 }
 0x1a6   : > { %v668_v11 = vpop.f32.mrf.mxu3 }
 0x1a7   : > { %760 = vmatpush.msra.mxu0 %v1111_v5  ;;  %710 = vmatpush.msrb.mxu2 %v668_v11 }
 0x1a9   : > { %761 = vmatpush.msra.mxu0 %v1110_v6  ;;  %711 = vmatpush.msrb.mxu2 %v665_v9 }
 0x1ab   : > { %762 = vmatpush.msra.mxu0 %v1109_v7  ;;  %712 = vmatpush.msrb.mxu2 %v1071_v8 }
 0x1ac   : > { %763 = vmatmul.f32.vlgmr.msra.gmra.mxu0 %v1071_v8 }
 0x1b4   : > { %766 = vmatmul.f32.gmra.mxu0 %v620_v10 }
 0x1fc   : > { %v623_v12 = vpop.f32.mrf.mxu1 }
 0x1fd   : > { %713 = vmatpush.msrb.mxu2 %v623_v12 }
 0x1ff   : > { %714 = vmatpush.msrb.mxu2 %v620_v10 }
 0x201   : > { %715 = vmatpush.msrb.mxu2 %v1071_v8 }
 0x202   : > { %1104 = vmatmul.msk.f32.vlgmr.msrb.gmra.mxu2 %vm406_vm0, %v1578_v55 }
 0x203   : > { %792 = vmatpush.msra.mxu2 %v1140_v13 }
 0x205   : > { %793 = vmatpush.msra.mxu2 %v1139_v14 }
 0x207   : > { %794 = vmatpush.msra.mxu2 %v1138_v15 }
 0x209   : > { %795 = vmatpush.msra.mxu2 %v1137_v16  ;;  %v573_v29 = vpop.f32.mrf.mxu0 }
 0x20a   : > { %1105 = vmatmul.msk.f32.gmra.mxu2 %vm406_vm0, %v1593_v62  ;;  %v574_v31 = vadd.f32 %v573_v29, %v543_v30 }
 0x20b   : > { %796 = vmatpush.msra.mxu2 %v1136_v17 }
 0x20c   : > { %1069 = vst [vmem:[%s1647_s10 + $0x10] sm:$0xff] %v574_v31 }
 0x20d   : > { %797 = vmatpush.msra.mxu2 %v1135_v18 }
 0x20f   : > { %798 = vmatpush.msra.mxu2 %v1134_v19 }
 0x211   : > { %799 = vmatpush.msra.mxu2 %v1133_v20  ;;  %v576_v32 = vpop.f32.mrf.mxu0 }
 0x212   : > { %v577_v34 = vadd.f32 %v576_v32, %v548_v33 }
 0x213   : > { %800 = vmatpush.msra.mxu2 %v1132_v21 }
 0x214   : > { %1070 = vst [vmem:[%s1647_s10 + $0x18] sm:$0xff] %v577_v34 }
 0x215   : > { %801 = vmatpush.msra.mxu2 %v1131_v22 }
 0x217   : > { %802 = vmatpush.msra.mxu2 %v1130_v23 }
 0x219   : > { %803 = vmatpush.msra.mxu2 %v1129_v24 }
 0x21b   : > { %804 = vmatpush.msra.mxu2 %v1128_v25 }
 0x21d   : > { %805 = vmatpush.msra.mxu2 %v1127_v26 }
 0x21f   : > { %806 = vmatpush.msra.mxu2 %v1126_v27 }
 0x221   : > { %807 = vmatpush.msra.mxu2 %v1125_v28 }
 0x222   : > { %808 = vmatmul.f32.vlgmr.msra.gmra.mxu2 %v1071_v8 }
 0x229   : > { %v764_v42 = vpop.f32.mrf.mxu0 }
 0x22a   : > { %811 = vmatmul.f32.gmra.mxu2 %v665_v9 }
 0x231   : > { %v767_v45 = vpop.f32.mrf.mxu0 }
 0x285   : > { %v717_v36 = vpop.f32.mrf.mxu2 }
 0x286   : > { %v718_v37 = vadd.f32 %v717_v36, %v687_v35 }
 0x288   : > { %1106 = vst [vmem:[%s1647_s10 + $0x20] sm:$0xff] %v718_v37 }
 0x28d   : > { %v720_v39 = vpop.f32.mrf.mxu2 }
 0x28e   : > { %v721_v40 = vadd.f32 %v720_v39, %v692_v38 }
 0x290   : > { %1107 = vst [vmem:[%s1647_s10 + $0x28] sm:$0xff] %v721_v40 }
 0x2a5   : > { %v809_v41 = vpop.f32.mrf.mxu2 }
 0x2ad   : > { %v812_v43 = vpop.f32.mrf.mxu2 }
 0x2ae   : > { %854 = vmatpush.msra.mxu1 %v812_v43 }
 0x2b0   : > { %855 = vmatpush.msra.mxu1 %v809_v41 }
 0x2b2   : > { %856 = vmatpush.msra.mxu1 %v1108_v44 }
 0x2b4   : > { %857 = vmatpush.msra.mxu1 %v767_v45 }
 0x2b6   : > { %858 = vmatpush.msra.mxu1 %v764_v42 }
 0x2b8   : > { %859 = vmatpush.msra.mxu1 %v1108_v44 }
 0x2b9   : > { %1141 = vmatmul.msk.f32.vlgmr.msra.gmra.mxu1 %vm406_vm0, %v1578_v55 }
 0x2c1   : > { %1142 = vmatmul.msk.f32.gmra.mxu1 %vm406_vm0, %v1593_v62 }
 0x336   : > { %v861_v47 = vpop.f32.mrf.mxu1 }
 0x337   : > { %v862_v48 = vadd.f32 %v861_v47, %v831_v46 }
 0x339   : > { %1143 = vst [vmem:[%s1647_s10 + $0x30] sm:$0xff] %v862_v48 }
 0x33e   : > { %v864_v50 = vpop.f32.mrf.mxu1 }
 0x33f   : > { %v865_v55 = vadd.f32 %v864_v50, %v836_v49 }
 0x341   : > { %1144 = vst [vmem:[%s1647_s10 + $0x38] sm:$0xff] %v865_v55 }
 0x342   : > { %1316 = shalt.err (!%p1313_p13)
}
 0x343   : > { %s1381_s12 = smov 128   ;;  %s1382_s8 = smov 8  }
 0x344   : > { %1157 = dma.vmem_to_hbm [thread:$0]  (%p1459_p9), %s887_s0, 1024, %s889_s5, %s871_s14, %s1381_s12, %s1381_s12, %s1382_s8  }
 0x345 PF: > { %s903_s25 = sand.u32 1, %s1355_s15   ;;  %p1167_p0 = pnand %p1005_p12, %p1466_p11 }
 0x346   : > { %s904_s9 = scalar_lea.sflag [#allocation5], %s903_s25 }
 0x347   : > { %p1168_p1 = pneg %p1167_p0 }
 0x349   : > { %1350 = dma.done.wait (%p1168_p1), %s904_s9, 1024  }
 0x34a   : > { %1352 = vsyncadd (%p1168_p1), %s904_s9, 4294966272  ;;  %s23_s20 = sadd.s32 1, %s1375_s20   ;;  %s1756_s28 = sld [smem:[#allocation12_spill]] }
 0x34b   : > { %p20_p2 = scmp.ge.s32.totalorder %s23_s20, 4   ;;  %s1757_s15 = smov %s1359_s16 }
 0x34c   : > { %s1758_s16 = smov %s1363_s17  ;;  %s1759_s17 = smov %s1464_s29 }
 0x34d   : > { %s1760_s18 = smov %s1371_s19  ;;  %22 = sbr.rel (!%p20_p2) target bundleno = 10 (0xa), region = 111 }
 0x350   : > { %s1761_s19 = smov %s1756_s28 }
 0x352   :  { %910 = vsyncpa [#allocation4], 1 }
 0x353   :  { %912 = vsyncpa [#allocation4 + $0x1], 1 }
 0x354   :  { %913 = vsyncpa [#allocation7], 1 }
 0x355   :  { %915 = vsyncpa [#allocation7 + $0x1], 1 }
 0x356   :  { %916 = vsyncpa [#allocation5], 1 }
 0x357   :  { %918 = vsyncpa [#allocation5 + $0x1], 1 }

</bundles_post_ra>
